<compile_context>
chip_gen: v7x
topology: tpu7x:2x2x1
jax: 0.10.0
libtpu: 0.0.40
codegen_flags: <defaults>
</compile_context>

<pallas_src>
import jax
import jax.numpy as jnp
import numpy as np
from jax import lax
from jax.experimental import pallas as pl
from jax.experimental.pallas import tpu as pltpu


def _round_up(x, m):
    return ((x + m - 1) // m) * m


# ----------------------------------------------------------------------------
# Pallas kernel: the whole forward pass in one launch (3 matmuls, 2 bias adds,
# 1 lane-dense store).
# ----------------------------------------------------------------------------
def _modnet_kernel(gamma_ref, wa_ref, ba_ref, wb_ref, bb_ref, out_ref):
    gamma = gamma_ref[...]                                     # (B, ctx)

    # alpha for ALL pairs at once: (B, DA_PAD). sum_da fits one MXU pass on
    # every generation (<=128 lanes), padded columns are zero.
    alpha = jnp.dot(gamma, wa_ref[...],
                    preferred_element_type=jnp.float32) + ba_ref[...]

    # beta^T for ALL pairs at once: (DB_PAD, B). Transposed-RHS contraction of
    # gamma (no gamma^T input, no in-kernel transpose).
    beta_t = lax.dot_general(wb_ref[...], gamma,
                             (((1,), (1,)), ((), ())),
                             preferred_element_type=jnp.float32) + bb_ref[...]

    # One K=B matmul produces every (db_i, da_i) modulation weight as a diagonal
    # block of the lane-dense output slab. Off-diagonal blocks are never read.
    out_ref[...] = jnp.dot(beta_t, alpha, preferred_element_type=jnp.float32)


def _modnet_slab(gamma, wa, ba, wb, bb, db_pad, da_pad):
    vmem = pl.BlockSpec(memory_space=pltpu.MemorySpace.VMEM)
    return pl.pallas_call(
        _modnet_kernel,
        out_shape=jax.ShapeDtypeStruct((db_pad, da_pad), jnp.float32),
        in_specs=[vmem] * 5,
        out_specs=vmem,
    )(gamma, wa, ba, wb, bb)


# ----------------------------------------------------------------------------
# One-time parameter prep (hoisted out of the per-call path).
# params: dict with "down"/"latent"/"up" lists of (wa(da,ctx), ba(da,),
#         wb(db,ctx), bb(db,)) in torch nn.Linear layout.
# ----------------------------------------------------------------------------
def prepare_modnet_params(params):
    pairs = list(params["down"]) + [params["latent"]] + list(params["up"])
    ctx = int(pairs[0][0].shape[1])
    da_sizes = [int(p[0].shape[0]) for p in pairs]
    db_sizes = [int(p[2].shape[0]) for p in pairs]
    da_pad = max(128, _round_up(sum(da_sizes), 128))   # lane-dense output slab
    db_pad = max(8, _round_up(sum(db_sizes), 8))

    wa_packed = jnp.zeros((ctx, da_pad), jnp.float32)   # alpha weights, ctx-major
    ba_packed = jnp.zeros((1, da_pad), jnp.float32)
    wb_packed = jnp.zeros((db_pad, ctx), jnp.float32)   # beta weights, torch layout
    bb_packed = jnp.zeros((db_pad, 1), jnp.float32)

    blocks = []
    da_off = db_off = 0
    for (wa, ba, wb, bb), da, db in zip(pairs, da_sizes, db_sizes):
        wa_packed = wa_packed.at[:, da_off:da_off + da].set(wa.T.astype(jnp.float32))
        ba_packed = ba_packed.at[0, da_off:da_off + da].set(ba.astype(jnp.float32))
        wb_packed = wb_packed.at[db_off:db_off + db, :].set(wb.astype(jnp.float32))
        bb_packed = bb_packed.at[db_off:db_off + db, 0].set(bb.astype(jnp.float32))
        blocks.append((db_off, da_off, db, da))
        da_off += da
        db_off += db

    meta = dict(num_pool_layers=len(params["down"]), blocks=tuple(blocks),
                da_pad=da_pad, db_pad=db_pad)
    return dict(wa=wa_packed, ba=ba_packed, wb=wb_packed, bb=bb_packed, meta=meta)


# ----------------------------------------------------------------------------
# Forward: one pallas_call + cheap wrapper slices/reshapes (jit-fusable).
# ----------------------------------------------------------------------------
def modnet_forward(prepped, gamma_val):
    meta = prepped["meta"]
    gamma = gamma_val.astype(jnp.float32)
    slab = _modnet_slab(gamma, prepped["wa"], prepped["ba"],
                        prepped["wb"], prepped["bb"],
                        meta["db_pad"], meta["da_pad"])
    outs = []
    for (r0, c0, db, da) in meta["blocks"]:
        outs.append(slab[r0:r0 + db, c0:c0 + da][:, :, None, None])
    npl = meta["num_pool_layers"]
    return outs[:npl], outs[npl], outs[npl + 1:]


# ----------------------------------------------------------------------------
# Pure-JAX reference (exact torch semantics) for a correctness check.
# ----------------------------------------------------------------------------
def modnet_forward_ref(params, gamma_val):
    def mod(pair):
        wa, ba, wb, bb = pair
        alpha = gamma_val @ wa.T + ba          # nn.Linear
        beta = gamma_val @ wb.T + bb
        return (beta.T @ alpha)[:, :, None, None]

    down = [mod(p) for p in params["down"]]
    latent = mod(params["latent"])
    up = [mod(p) for p in params["up"]]
    return down, latent, up


# ----------------------------------------------------------------------------
# Deterministic parameter init (torch nn.Linear-style: W (out, in), b (out,)).
# ----------------------------------------------------------------------------
def _init_linear(key, in_f, out_f):
    kw, kb = jax.random.split(key)
    s = 1.0 / float(np.sqrt(in_f))
    w = jax.random.uniform(kw, (out_f, in_f), jnp.float32, -s, s)
    b = jax.random.uniform(kb, (out_f,), jnp.float32, -s, s)
    return w, b


def init_modnet_params(key, ctx, in_chans, out_chans, chans, num_pool_layers):
    # out_chans is accepted (as in the torch __init__) but unused by the module.
    keys = iter(jax.random.split(key, 4 * (2 * num_pool_layers + 1) + 4))

    down = []
    wa, ba = _init_linear(next(keys), ctx, in_chans)     # alpha_down[0]
    wb, bb = _init_linear(next(keys), ctx, chans)        # beta_down[0]
    down.append((wa, ba, wb, bb))
    ch = chans
    for _ in range(num_pool_layers - 1):
        wa, ba = _init_linear(next(keys), ctx, ch)       # alpha_down[i]
        wb, bb = _init_linear(next(keys), ctx, ch * 2)   # beta_down[i]
        down.append((wa, ba, wb, bb))
        ch *= 2

    wa, ba = _init_linear(next(keys), ctx, ch)           # alpha_latent
    wb, bb = _init_linear(next(keys), ctx, ch)           # beta_latent
    latent = (wa, ba, wb, bb)

    up = []
    for _ in range(num_pool_layers - 1):
        wa, ba = _init_linear(next(keys), ctx, ch * 2)   # alpha_up[i]
        wb, bb = _init_linear(next(keys), ctx, ch // 2)  # beta_up[i]
        up.append((wa, ba, wb, bb))
        ch //= 2
    wa, ba = _init_linear(next(keys), ctx, ch * 2)       # alpha_up[-1]
    wb, bb = _init_linear(next(keys), ctx, ch)           # beta_up[-1]
    up.append((wa, ba, wb, bb))

    return dict(down=down, latent=latent, up=up)


# ----------------------------------------------------------------------------
if __name__ == "__main__":
    key = jax.random.PRNGKey(0)
    k_g, k_p = jax.random.split(key)

    # Small shapes consistent with the module.
    B, contextvectorsize = 2, 32
    in_chans, out_chans, chans, num_pool_layers = 4, 4, 8, 2

    gamma_val = jax.random.normal(k_g, (B, contextvectorsize), jnp.float32)
    params = init_modnet_params(k_p, contextvectorsize, in_chans, out_chans,
                                chans, num_pool_layers)

    # One-time prep (packed, pre-transposed weights & biases) — not per call.
    prepped = prepare_modnet_params(params)

    down, latent, up = modnet_forward(prepped, gamma_val)
    (down, latent, up) = jax.block_until_ready((down, latent, up))

    # Shape checks (match torch: (dim_beta, dim_alpha, 1, 1)).
    assert down[0].shape == (chans, in_chans, 1, 1), down[0].shape       # (8, 4, 1, 1)
    assert down[1].shape == (chans * 2, chans, 1, 1), down[1].shape      # (16, 8, 1, 1)
    assert latent.shape == (chans * 2, chans * 2, 1, 1), latent.shape    # (16, 16, 1, 1)
    assert up[0].shape == (chans, chans * 4, 1, 1), up[0].shape          # (8, 32, 1, 1)
    assert up[1].shape == (chans, chans * 2, 1, 1), up[1].shape          # (8, 16, 1, 1)

    # Numerical check against the pure-JAX reference.
    r_down, r_latent, r_up = modnet_forward_ref(params, gamma_val)
    for got, ref in zip(down + [latent] + up, r_down + [r_latent] + r_up):
        np.testing.assert_allclose(np.asarray(got), np.asarray(ref),
                                   rtol=1e-4, atol=1e-4)

    print("KERNEL_OK")
</pallas_src>

<mosaic_0001>
module attributes {stable_mosaic.version = 11 : i64} {
  func.func @_modnet_kernel(%arg0: memref<2x32xf32, #tpu.memory_space<vmem>>, %arg1: memref<32x128xf32, #tpu.memory_space<vmem>>, %arg2: memref<1x128xf32, #tpu.memory_space<vmem>>, %arg3: memref<56x32xf32, #tpu.memory_space<vmem>>, %arg4: memref<56x1xf32, #tpu.memory_space<vmem>>, %arg5: memref<56x128xf32, #tpu.memory_space<vmem>>) attributes {dimension_semantics = [], scalar_prefetch = 0 : i64, scratch_operands = 0 : i64, tpu.core_type = #tpu.core_type<tc>} {
    %c0 = arith.constant 0 : index
    %c0_0 = arith.constant 0 : index
    %0 = vector.load %arg0[%c0, %c0_0] : memref<2x32xf32, #tpu.memory_space<vmem>>, vector<2x32xf32>
    %c0_1 = arith.constant 0 : index
    %c0_2 = arith.constant 0 : index
    %1 = vector.load %arg1[%c0_1, %c0_2] : memref<32x128xf32, #tpu.memory_space<vmem>>, vector<32x128xf32>
    %cst = arith.constant dense<0.000000e+00> : vector<2x128xf32>
    %2 = tpu.matmul %0, %1, %cst {dimension_numbers = #tpu.dot_dimension_numbers<[1], [0], [0], [1], [0, 0, 1, 1], [], []>} : vector<2x32xf32>, vector<32x128xf32>, vector<2x128xf32> -> vector<2x128xf32>
    %c0_3 = arith.constant 0 : index
    %c0_4 = arith.constant 0 : index
    %3 = vector.load %arg2[%c0_3, %c0_4] : memref<1x128xf32, #tpu.memory_space<vmem>>, vector<1x128xf32>
    %4 = vector.broadcast %3 : vector<1x128xf32> to vector<2x128xf32>
    %5 = arith.addf %2, %4 : vector<2x128xf32>
    %c0_5 = arith.constant 0 : index
    %c0_6 = arith.constant 0 : index
    %6 = vector.load %arg3[%c0_5, %c0_6] : memref<56x32xf32, #tpu.memory_space<vmem>>, vector<56x32xf32>
    %cst_7 = arith.constant dense<0.000000e+00> : vector<56x2xf32>
    %7 = tpu.matmul %6, %0, %cst_7 {dimension_numbers = #tpu.dot_dimension_numbers<[1], [1], [0], [0], [0, 0, 1, 0], [], []>} : vector<56x32xf32>, vector<2x32xf32>, vector<56x2xf32> -> vector<56x2xf32>
    %c0_8 = arith.constant 0 : index
    %c0_9 = arith.constant 0 : index
    %8 = vector.load %arg4[%c0_8, %c0_9] : memref<56x1xf32, #tpu.memory_space<vmem>>, vector<56x1xf32>
    %9 = vector.broadcast %8 : vector<56x1xf32> to vector<56x2xf32>
    %10 = arith.addf %7, %9 : vector<56x2xf32>
    %cst_10 = arith.constant dense<0.000000e+00> : vector<56x128xf32>
    %11 = tpu.matmul %10, %5, %cst_10 {dimension_numbers = #tpu.dot_dimension_numbers<[1], [0], [0], [1], [0, 0, 1, 1], [], []>} : vector<56x2xf32>, vector<2x128xf32>, vector<56x128xf32> -> vector<56x128xf32>
    %c0_11 = arith.constant 0 : index
    %c0_12 = arith.constant 0 : index
    %12 = vector.load %arg5[%c0_11, %c0_12] : memref<56x128xf32, #tpu.memory_space<vmem>>, vector<56x128xf32>
    tpu.vector_store %arg5[%c0_11, %c0_12], %11 {strides = array<i32>} : memref<56x128xf32, #tpu.memory_space<vmem>>, vector<56x128xf32>,
    return
  }
}

</mosaic_0001>

<bundles_post_ra>
// kernel: tpu_custom_call.1
= control target key start
LH: loop header
LB: loop body
LE: loop exit
PB: predicated region body
PF: predicated region fallthrough
CT: control target
= control target key end

     0   :  { %vm33_vm0 = vcmask 261120   ;;  %v563_v2 = vmov 0.0   ;;  %v564_v3 = vmov 0.0|0.0   ;;  %vm565_vm1 = vmmov 0   ;;  %s721_s0 = inlined_call_operand.vmem [shape: f32[2,32], index: 0, kind: input, shape index: {}]   ;;  %s722_s1 = inlined_call_operand.vmem [shape: f32[32,128], index: 1, kind: input, shape index: {}]   ;;  %s723_s2 = inlined_call_operand.vmem [shape: f32[1,128], index: 2, kind: input, shape index: {}]   ;;  %s724_s3 = inlined_call_operand.vmem [shape: f32[56,32], index: 3, kind: input, shape index: {}]   ;;  %s725_s4 = inlined_call_operand.vmem [shape: f32[56,1], index: 4, kind: input, shape index: {}]   ;;  %s726_s5 = inlined_call_operand.hbm [shape: f32[56,128], index: 5, kind: output, shape index: {}]  }
   0x1   :  { %v21_v0 = vld [vmem:[%s721_s0] sm:$0x3]  ;;  %476 = vmatprep.subr.mxu1 %v563_v2  ;;  %522 = vmatprep.subr.bf16.mxu0 %v564_v3  ;;  %v23_v4 = vld [vmem:[%s722_s1 + $0x8] sm:$0xff]  ;;  %v24_v5 = vld [vmem:[%s722_s1 + $0x10] sm:$0xff]  ;;  %v566_v9 = vmov 0  }
   0x2   :  { %v22_v1 = vld [vmem:[%s722_s1] sm:$0xff]  ;;  %477 = vmatpush3.xpose.msk.msra.mxu1 %vm33_vm0, %v21_v0  ;;  %478 = vmatprep.mubr.msk.f32.mxu1 %vm565_vm1, %v563_v2  ;;  %v25_v8 = vld [vmem:[%s722_s1 + $0x18] sm:$0xff]  ;;  %v116_v12 = vld [vmem:[%s725_s4 + $0x10] sm:$0xff] }
   0x3   :  { %v523_v6 = vpack.c.bf16 %v23_v4, %v22_v1  ;;  %v107_v7 = vld [vmem:[%s724_s3] sm:$0xff]  ;;  %473 = vmatprep.mubr.msk.f32.mxu0 %vm565_vm1, %v563_v2  ;;  %537 = vset.pattern.permute.xlu0 %v566_v9  ;;  %v526_v10 = vpack.c.bf16 %v25_v8, %v24_v5  ;;  %v108_v13 = vld [vmem:[%s724_s3 + $0x8] sm:$0xff] }
   0x4   :  { %v114_v11 = vld [vmem:[%s725_s4] sm:$0xff]  ;;  %538 = vset.pattern.permute.xlu1 %v566_v9 }
   0x5   :  { %524 = vmatpush3.bf16.msra.mxu0 %v523_v6  ;;  %479 = vmatmul.mubr.msk.f32.vlgmr.msra.gmra.mrb[0].mxu1 %vm33_vm0, %v107_v7 }
   0x6   :  { %525 = vmatprep.subr.bf16.mxu0 %v564_v3  ;;  %481 = vmatprep.mubr.msk.f32.mxu1 %vm565_vm1, %v563_v2 }
   0x7   :  { %123 = vperm.xlu0 %537, %v114_v11  }
   0x8   :  { %10 = vsyncpa [#allocation3], 0  ;;  %v115_v14 = vld [vmem:[%s725_s4 + $0x8] sm:$0xff]  ;;  %133 = vperm.xlu1 %538, %v116_v12   ;;  %528 = vmatprep.subr.mxu1 %v563_v2  ;;  %v117_v15 = vld [vmem:[%s725_s4 + $0x18] sm:$0xff]  ;;  %vm299_vm2 = vcmask 1041408   ;;  %vm277_vm3 = vcmask 15360  }
   0x9   :  { %527 = vmatpush3.bf16.msra.mxu0 %v526_v10  ;;  %482 = vmatmul.mubr.msk.f32.gmra.mrb[2].mxu1 %vm33_vm0, %v108_v13  ;;  %v109_v16 = vld [vmem:[%s724_s3 + $0x10] sm:$0xff]  ;;  %v118_v17 = vld [vmem:[%s725_s4 + $0x20] sm:$0xff]  ;;  %v119_v18 = vld [vmem:[%s725_s4 + $0x28] sm:$0xff] }
   0xa   :  { %499 = vmatprep.subr.mxu0 %v563_v2  ;;  %484 = vmatprep.mubr.msk.f32.mxu1 %vm565_vm1, %v563_v2  ;;  %v110_v19 = vld [vmem:[%s724_s3 + $0x18] sm:$0xff]  ;;  %v120_v20 = vld [vmem:[%s725_s4 + $0x30] sm:$0xff]  ;;  %v111_v21 = vld [vmem:[%s724_s3 + $0x20] sm:$0xff] }
   0xb   :  { %128 = vperm.xlu0 %537, %v115_v14   ;;  %v112_v22 = vld [vmem:[%s724_s3 + $0x28] sm:$0xff]  ;;  %v113_v23 = vld [vmem:[%s724_s3 + $0x30] sm:$0xff]  ;;  %v426_v26 = vld [vmem:[%s723_s2] ss:$0 sm:$0xff]  ;;  %s567_s2 = smov [#allocation2]  }
   0xc   :  { %474 = vmatmul.mubr.msk.f32.vlgmr.msra.gmra.mrb[0].mxu0 %vm33_vm0, %v21_v0  ;;  %138 = vperm.xlu1 %538, %v117_v15   ;;  %s415_s3 = sshll.u32 %s567_s2, 4  ;;  %s416_s3 = int_to_ptr.vmem [resolvable:$true] %s415_s3 }
   0xd   :  { %501 = vmatprep.mubr.msk.f32.mxu0 %vm565_vm1, %v563_v2  ;;  %485 = vmatmul.mubr.msk.f32.gmra.mrb[4].mxu1 %vm33_vm0, %v109_v16  ;;  %s539_s29 = scalar_lea.vmem %s416_s3, 896  ;;  %p544_p1 = scmp.lt.s32.totalorder %s416_s3, %s416_s3 }
   0xe   :  { %487 = vmatprep.mubr.msk.f32.mxu1 %vm565_vm1, %v563_v2  ;;  %p540_p0 = scmp.ne.s32.totalorder %s416_s3, %s539_s29  ;;  %p545_p2 = scmp.lt.s32.totalorder %s539_s29, %s539_s29 }
   0xf   :  { %143 = vperm.xlu0 %537, %v118_v17  }
  0x10   :  { %148 = vperm.xlu1 %538, %v119_v18   ;;  %p546_p3 = por %p545_p2, %p544_p1 }
  0x11   :  { %488 = vmatmul.mubr.msk.f32.gmra.mrb[6].mxu1 %vm33_vm0, %v110_v19 }
  0x12   :  { %490 = vmatprep.mubr.msk.f32.mxu1 %vm565_vm1, %v563_v2  ;;  %p547_p4 = pnand %p546_p3, %p540_p0 }
  0x13   :  { %153 = vperm.xlu0 %537, %v120_v20  }
  0x15   :  { %491 = vmatmul.mubr.msk.f32.gmra.mrb[8].mxu1 %vm33_vm0, %v111_v21 }
  0x16   :  { %493 = vmatprep.mubr.msk.f32.mxu1 %vm565_vm1, %v563_v2 }
  0x19   :  { %494 = vmatmul.mubr.msk.f32.gmra.mrb[10].mxu1 %vm33_vm0, %v112_v22 }
  0x1a   :  { %496 = vmatprep.mubr.msk.f32.mxu1 %vm565_vm1, %v563_v2 }
  0x1d   :  { %497 = vmatmul.mubr.msk.f32.gmra.mrb[12].mxu1 %vm33_vm0, %v113_v23 }
  0x1e   :  { %519 = vmatprep.mubr.msk.f32.mxu1 %vm565_vm1, %v563_v2 }
  0x86   :  { %v124_v28 = vpop.permute.xlu0 %123 }
  0x87   :  { %v134_v39 = vpop.permute.xlu1 %133 }
  0x8a   :  { %v129_v36 = vpop.permute.xlu0 %128 }
  0x8b   :  { %v139_v45 = vpop.permute.xlu1 %138 }
  0x8e   :  { %v144_v44 = vpop.permute.xlu0 %143 }
  0x8f   :  { %v149_v54 = vpop.permute.xlu1 %148 }
  0x92   :  { %v154_v49 = vpop.permute.xlu0 %153 }
  0xd8   :  { %v243_v24 = vpop.f32.mrb[0].mxu1 }
  0xd9   :  { %v480_v25 = vpop.f32.mrb[1].mxu1  ;;  %v244_v33 = vadd.f32 %v243_v24, %v124_v28 }
  0xdc   :  { %v248_v27 = vpop.f32.mrb[2].mxu1 }
  0xdd   :  { %v483_v29 = vpop.f32.mrb[3].mxu1  ;;  %v249_v37 = vadd.f32 %v248_v27, %v129_v36 }
  0xdf   :  { %v103_v30 = vpop.f32.mrb[0].mxu0 }
  0xe0   :  { %v104_v31 = vadd.f32 %v426_v26, %v103_v30  ;;  %v475_v32 = vpop.f32.mrb[1].mxu0  ;;  %v253_v34 = vpop.f32.mrb[4].mxu1 }
  0xe1   :  { %v486_v35 = vpop.f32.mrb[5].mxu1  ;;  %v254_v41 = vadd.f32 %v253_v34, %v134_v39 }
  0xe2   :  { %500 = vmatpush3.msk.msra.mxu0 %vm299_vm2, %v104_v31  ;;  %529 = vmatpush3.msk.msra.mxu1 %vm299_vm2, %v104_v31 }
  0xe3   :  { %502 = vmatmul.mubr.msk.f32.vlgmr.msra.gmra.mrb[2].mxu0 %vm277_vm3, %v244_v33 }
  0xe4   :  { %504 = vmatprep.mubr.msk.f32.mxu0 %vm565_vm1, %v563_v2  ;;  %v258_v38 = vpop.f32.mrb[6].mxu1 }
  0xe5   :  { %v489_v40 = vpop.f32.mrb[7].mxu1  ;;  %v259_v46 = vadd.f32 %v258_v38, %v139_v45 }
  0xe7   :  { %505 = vmatmul.mubr.msk.f32.gmra.mrb[4].mxu0 %vm277_vm3, %v249_v37 }
  0xe8   :  { %507 = vmatprep.mubr.msk.f32.mxu0 %vm565_vm1, %v563_v2  ;;  %v263_v42 = vpop.f32.mrb[8].mxu1 }
  0xe9   :  { %v492_v43 = vpop.f32.mrb[9].mxu1  ;;  %v264_v50 = vadd.f32 %v263_v42, %v144_v44 }
  0xeb   :  { %508 = vmatmul.mubr.msk.f32.gmra.mrb[6].mxu0 %vm277_vm3, %v254_v41 }
  0xec   :  { %510 = vmatprep.mubr.msk.f32.mxu0 %vm565_vm1, %v563_v2  ;;  %v268_v47 = vpop.f32.mrb[10].mxu1 }
  0xed   :  { %v495_v48 = vpop.f32.mrb[11].mxu1  ;;  %v269_v55 = vadd.f32 %v268_v47, %v149_v54 }
  0xef   :  { %511 = vmatmul.mubr.msk.f32.gmra.mrb[8].mxu0 %vm277_vm3, %v259_v46 }
  0xf0   :  { %513 = vmatprep.mubr.msk.f32.mxu0 %vm565_vm1, %v563_v2  ;;  %v273_v51 = vpop.f32.mrb[12].mxu1 }
  0xf1   :  { %v274_v52 = vadd.f32 %v273_v51, %v154_v49  ;;  %v498_v53 = vpop.f32.mrb[13].mxu1 }
  0xf3   :  { %514 = vmatmul.mubr.msk.f32.gmra.mrb[10].mxu0 %vm277_vm3, %v264_v50  ;;  %520 = vmatmul.mubr.msk.f32.vlgmr.msra.gmra.mrb[14].mxu1 %vm277_vm3, %v274_v52 }
  0xf4   :  { %516 = vmatprep.mubr.msk.f32.mxu0 %vm565_vm1, %v563_v2 }
  0xf7   :  { %517 = vmatmul.mubr.msk.f32.gmra.mrb[12].mxu0 %vm277_vm3, %v269_v55 }
 0x1b6   :  { %v369_v56 = vpop.f32.mrb[2].mxu0 }
 0x1b7   :  { %403 = vst [vmem:[#allocation2] sm:$0xff] %v369_v56  ;;  %v503_v57 = vpop.f32.mrb[3].mxu0 }
 0x1ba   :  { %v374_v58 = vpop.f32.mrb[4].mxu0 }
 0x1bb   :  { %404 = vst [vmem:[#allocation2 + $0x8] sm:$0xff] %v374_v58  ;;  %v506_v59 = vpop.f32.mrb[5].mxu0 }
 0x1be   :  { %v379_v60 = vpop.f32.mrb[6].mxu0 }
 0x1bf   :  { %405 = vst [vmem:[#allocation2 + $0x10] sm:$0xff] %v379_v60  ;;  %v509_v61 = vpop.f32.mrb[7].mxu0 }
 0x1c2   :  { %v384_v62 = vpop.f32.mrb[8].mxu0 }
 0x1c3   :  { %406 = vst [vmem:[#allocation2 + $0x18] sm:$0xff] %v384_v62  ;;  %v512_v63 = vpop.f32.mrb[9].mxu0 }
 0x1c6   :  { %v389_v0 = vpop.f32.mrb[10].mxu0  ;;  %v399_v2 = vpop.f32.mrb[14].mxu1 }
 0x1c7   :  { %407 = vst [vmem:[#allocation2 + $0x20] sm:$0xff] %v389_v0  ;;  %v515_v1 = vpop.f32.mrb[11].mxu0  ;;  %409 = vst [vmem:[#allocation2 + $0x30] sm:$0xff] %v399_v2  ;;  %v521_v3 = vpop.f32.mrb[15].mxu1 }
 0x1ca   :  { %v394_v4 = vpop.f32.mrb[12].mxu0 }
 0x1cb   :  { %408 = vst [vmem:[#allocation2 + $0x28] sm:$0xff] %v394_v4  ;;  %v518_v5 = vpop.f32.mrb[13].mxu0 }
 0x1cc   :  { %550 = shalt.err (!%p547_p4)
}
 0x1cd   :  { %s551_s7 = scalar_lea.hbm %s726_s5, 896 }
 0x1ce   :  { %p552_p5 = scmp.ne.s32.totalorder %s726_s5, %s551_s7  ;;  %p555_p6 = scmp.lt.u32.totalorder %s551_s7, %s726_s5 }
 0x1d0   :  { %p557_p7 = pnand %p555_p6, %p552_p5 }
 0x1d2   :  { %560 = shalt.err (!%p557_p7)
}
 0x1d3   :  { %s568_s11 = smov 128   ;;  %s569_s12 = smov 8  }
 0x1d4   :  { %421 = dma.vmem_to_hbm [thread:$0]  %s416_s3, 896, %s726_s5, [#allocation3], %s568_s11, %s568_s11, %s569_s12  }
 0x1d5   :  { %561 = dma.done.wait [#allocation3], 896  }
 0x1d6   :  { %562 = vsyncadd [#allocation3], 4294966400 }
 0x1d7   :  { %425 = vsyncpa [#allocation3], 1 }

</bundles_post_ra>
